<compile_context>
chip_gen: v7x
topology: tpu7x:2x2x1
jax: 0.10.0
libtpu: 0.0.40
codegen_flags: <defaults>
</compile_context>

<pallas_src>
import functools

import jax
import jax.numpy as jnp
from jax.experimental import pallas as pl
from jax.experimental.pallas import tpu as pltpu


def _round_up(x, m):
    return (x + m - 1) // m * m


# ---------------------------------------------------------------------------
# Kernel A: all weights VMEM-resident, grid tiled over batch only.
# ---------------------------------------------------------------------------
def _mlp_fused_kernel(x_ref, w1_ref, b1_ref, wh_ref, bh_ref, w2_ref, b2_ref,
                      o_ref, *, num_hl, max_limit):
    """x:(TB,IN) w1:(IN,H) b1:(1,H) wh:(NHL,H,H) bh:(NHL,1,H)
    w2:(H,OUT) b2:(1,OUT) o:(TB,OUT)"""
    w_dtype = w1_ref.dtype
    x = x_ref[...].astype(w_dtype)

    # first layer + ReLU (f32 accumulate, f32 epilogue)
    h = jnp.dot(x, w1_ref[...], preferred_element_type=jnp.float32)
    h = jnp.maximum(h + b1_ref[...].astype(jnp.float32), 0.0)

    # hidden layers + ReLU (static unroll; num_hl is a compile-time constant)
    for idx in range(num_hl):
        h = jnp.dot(h.astype(w_dtype), wh_ref[idx],
                    preferred_element_type=jnp.float32)
        h = jnp.maximum(h + bh_ref[idx].astype(jnp.float32), 0.0)

    # last layer in natural layout: M = TB on the MXU, no transpose of h
    out = jnp.dot(h.astype(w_dtype), w2_ref[...],
                  preferred_element_type=jnp.float32)
    out = out + b2_ref[...].astype(jnp.float32)

    # clampSTE_max forward: clamp from above at max_limit
    o_ref[...] = jnp.minimum(out, max_limit).astype(o_ref.dtype)


# ---------------------------------------------------------------------------
# Kernel B: hidden-layer weights streamed over a second ("arbitrary") grid
# axis; (TB, H) activation carried across layer steps in VMEM scratch.
# ---------------------------------------------------------------------------
def _mlp_streamed_kernel(x_ref, w1_ref, b1_ref, wh_ref, bh_ref, w2_ref, b2_ref,
                         o_ref, h_scratch, *, max_limit):
    """wh block is (1,H,H), bh block is (1,1,H); one hidden layer per step."""
    layer = pl.program_id(1)
    w_dtype = w1_ref.dtype

    @pl.when(layer == 0)
    def _():
        x = x_ref[...].astype(w_dtype)
        h0 = jnp.dot(x, w1_ref[...], preferred_element_type=jnp.float32)
        h_scratch[...] = jnp.maximum(h0 + b1_ref[...].astype(jnp.float32), 0.0)

    h = jnp.dot(h_scratch[...].astype(w_dtype), wh_ref[0],
                preferred_element_type=jnp.float32)
    h_scratch[...] = jnp.maximum(h + bh_ref[0].astype(jnp.float32), 0.0)

    @pl.when(layer == pl.num_programs(1) - 1)
    def _():
        out = jnp.dot(h_scratch[...].astype(w_dtype), w2_ref[...],
                      preferred_element_type=jnp.float32)
        out = out + b2_ref[...].astype(jnp.float32)
        o_ref[...] = jnp.minimum(out, max_limit).astype(o_ref.dtype)


# ---------------------------------------------------------------------------
# Wrapper
# ---------------------------------------------------------------------------
@functools.lru_cache(maxsize=1)
def _vmem_capacity_bytes():
    try:
        return int(pltpu.get_tpu_info().vmem_capacity_bytes)
    except Exception:
        return 64 << 20                       # conservative (v7x); v5e/v6e: 128 MiB


def _choose_batch_tile(batch, itemsize):
    """Big MXU-friendly tiles; >= 2 grid steps once the batch allows it (v7x
    has 2 TensorCores and the batch axis is 'parallel')."""
    sub = 16 if itemsize == 2 else 8
    batch_r = _round_up(batch, sub)
    if batch_r <= 2 * sub:
        return batch_r                        # too small to split
    half = _round_up((batch_r + 1) // 2, sub)
    # 512-row cap: measured tile sweep reaches ~85% of roofline at 512 vs 63% at 256
    return min(512, half)


def clamp_lr_net_forward(x, params, *, num_hl, max_limit, batch_tile=None,
                         compute_dtype=None, stream_hidden_layers=None):
    """Fused ClampLRNet forward as a single pallas_call.  Returns (B, OUT).

    compute_dtype: optional MXU operand dtype (e.g. jnp.bfloat16 on v6e/v7x);
                   accumulation stays f32, output keeps x's original dtype.
    stream_hidden_layers: None = auto (based on VMEM fit), or force True/False.
    """
    assert num_hl >= 1, "this kernel expects at least one hidden layer"
    out_dtype = x.dtype

    w1, b1, wh, bh, w2, b2 = params
    if compute_dtype is not None:
        x = x.astype(compute_dtype)
        w1, b1, wh, bh, w2, b2 = (p.astype(compute_dtype)
                                  for p in (w1, b1, wh, bh, w2, b2))

    B, IN = x.shape
    H = w1.shape[1]
    OUT = w2.shape[1]
    itemsize = x.dtype.itemsize

    if batch_tile is None:
        batch_tile = _choose_batch_tile(B, itemsize)
    B_pad = _round_up(B, batch_tile)
    if B_pad != B:
        x = jnp.pad(x, ((0, B_pad - B), (0, 0)))
    n_tiles = B_pad // batch_tile

    weight_bytes = sum(int(p.size) * p.dtype.itemsize
                       for p in (w1, b1, wh, bh, w2, b2))
    hidden_w_bytes = (int(wh.size) + int(bh.size)) * itemsize
    # double-buffered activation/output tiles + f32 hidden intermediate
    tile_bytes = 2 * batch_tile * (IN + OUT) * itemsize + 2 * batch_tile * H * 4
    budget = (_vmem_capacity_bytes() * 7) // 8

    if stream_hidden_layers is None:
        stream_hidden_layers = (2 * weight_bytes + tile_bytes + (4 << 20)) > budget

    flops = 2 * B_pad * (IN * H + num_hl * H * H + H * OUT)

    if not stream_hidden_layers:
        kernel = functools.partial(_mlp_fused_kernel, num_hl=num_hl,
                                   max_limit=float(max_limit))
        in_specs = [
            pl.BlockSpec((batch_tile, IN), lambda i: (i, 0)),       # activations
            pl.BlockSpec((IN, H), lambda i: (0, 0)),                # w1
            pl.BlockSpec((1, H), lambda i: (0, 0)),                 # b1
            pl.BlockSpec((num_hl, H, H), lambda i: (0, 0, 0)),      # wh (resident)
            pl.BlockSpec((num_hl, 1, H), lambda i: (0, 0, 0)),      # bh
            pl.BlockSpec((H, OUT), lambda i: (0, 0)),               # w2
            pl.BlockSpec((1, OUT), lambda i: (0, 0)),               # b2
        ]
        out_specs = pl.BlockSpec((batch_tile, OUT), lambda i: (i, 0))
        grid = (n_tiles,)
        dims = ("parallel",)
        scratch = []
        bytes_accessed = weight_bytes + B_pad * (IN + OUT) * itemsize
        vmem_est = 2 * weight_bytes + tile_bytes + (4 << 20)
    else:
        kernel = functools.partial(_mlp_streamed_kernel,
                                   max_limit=float(max_limit))
        in_specs = [
            pl.BlockSpec((batch_tile, IN), lambda i, l: (i, 0)),
            pl.BlockSpec((IN, H), lambda i, l: (0, 0)),
            pl.BlockSpec((1, H), lambda i, l: (0, 0)),
            pl.BlockSpec((1, H, H), lambda i, l: (l, 0, 0)),        # streamed
            pl.BlockSpec((1, 1, H), lambda i, l: (l, 0, 0)),        # streamed
            pl.BlockSpec((H, OUT), lambda i, l: (0, 0)),
            pl.BlockSpec((1, OUT), lambda i, l: (0, 0)),
        ]
        out_specs = pl.BlockSpec((batch_tile, OUT), lambda i, l: (i, 0))
        grid = (n_tiles, num_hl)
        dims = ("parallel", "arbitrary")
        scratch = [pltpu.VMEM((batch_tile, H), jnp.float32)]
        bytes_accessed = (weight_bytes - hidden_w_bytes
                          + n_tiles * hidden_w_bytes
                          + B_pad * (IN + OUT) * itemsize)
        resident_w = weight_bytes - hidden_w_bytes
        vmem_est = (2 * resident_w + 2 * (H * H + H) * itemsize
                    + tile_bytes + batch_tile * H * 4 + (4 << 20))

    cost = pl.CostEstimate(flops=int(flops), transcendentals=0,
                           bytes_accessed=int(bytes_accessed))
    vmem_limit = int(min(max(vmem_est, 32 << 20), budget))

    call = pl.pallas_call(
        kernel,
        out_shape=jax.ShapeDtypeStruct((B_pad, OUT), out_dtype),
        grid_spec=pltpu.PrefetchScalarGridSpec(
            num_scalar_prefetch=0,
            grid=grid,
            in_specs=in_specs,
            out_specs=out_specs,
            scratch_shapes=scratch,
        ),
        compiler_params=pltpu.CompilerParams(
            dimension_semantics=dims,
            vmem_limit_bytes=vmem_limit),
        cost_estimate=cost,
    )
    out = call(x, w1, b1, wh, bh, w2, b2)
    return out[:B]


# ---------------------------------------------------------------------------
# Params + pure-JAX reference
# ---------------------------------------------------------------------------
def init_params(key, input_size, hl_size, output_size, num_hl, dtype=jnp.float32):
    """Deterministic init (uniform, PyTorch-Linear-like fan-in scale)."""
    ks = jax.random.split(key, 6)

    def lin(kw, kb, fan_in, fan_out):
        bound = 1.0 / jnp.sqrt(fan_in)
        w = jax.random.uniform(kw, (fan_in, fan_out), dtype, -bound, bound)
        b = jax.random.uniform(kb, (1, fan_out), dtype, -bound, bound)
        return w, b

    w1, b1 = lin(ks[0], ks[1], input_size, hl_size)

    wh_list, bh_list = [], []
    hk = jax.random.split(ks[2], 2 * max(num_hl, 1))
    for i in range(num_hl):
        w, b = lin(hk[2 * i], hk[2 * i + 1], hl_size, hl_size)
        wh_list.append(w)
        bh_list.append(b[None])                          # (1, 1, H)
    wh = jnp.stack(wh_list, axis=0)                      # (num_hl, H, H)
    bh = jnp.concatenate(bh_list, axis=0)                # (num_hl, 1, H)

    w2, b2 = lin(ks[3], ks[4], hl_size, output_size)
    return w1, b1, wh, bh, w2, b2


def reference_forward(x, params, *, num_hl, max_limit):
    w1, b1, wh, bh, w2, b2 = params
    h = jnp.maximum(x @ w1 + b1, 0.0)
    for i in range(num_hl):
        h = jnp.maximum(h @ wh[i] + bh[i], 0.0)
    out = h @ w2 + b2
    return jnp.minimum(out, max_limit)


if __name__ == "__main__":
    key = jax.random.PRNGKey(0)
    kx, kp, kx2, kp2 = jax.random.split(key, 4)

    # --- small shapes consistent with the module (single grid step) ---
    INPUT_SIZE, HL_SIZE, OUTPUT_SIZE, NUM_HL = 4, 32, 1, 1
    MAX_LIMIT, BATCH = 1.0, 16

    x = jax.random.normal(kx, (BATCH, INPUT_SIZE), jnp.float32)
    params = init_params(kp, INPUT_SIZE, HL_SIZE, OUTPUT_SIZE, NUM_HL)
    out = jax.block_until_ready(
        clamp_lr_net_forward(x, params, num_hl=NUM_HL, max_limit=MAX_LIMIT))
    ref = reference_forward(x, params, num_hl=NUM_HL, max_limit=MAX_LIMIT)
    assert out.shape == (BATCH, OUTPUT_SIZE)
    assert jnp.allclose(out, ref, atol=1e-5, rtol=1e-5), "small-shape mismatch"

    # --- larger run: batch padding + two batch tiles + multi-step grid ---
    B2, IN2, H2, OUT2, NHL2 = 600, 16, 128, 8, 2
    x2 = jax.random.normal(kx2, (B2, IN2), jnp.float32)
    params2 = init_params(kp2, IN2, H2, OUT2, NHL2)
    out2 = jax.block_until_ready(
        clamp_lr_net_forward(x2, params2, num_hl=NHL2, max_limit=0.5))
    ref2 = reference_forward(x2, params2, num_hl=NHL2, max_limit=0.5)
    assert out2.shape == (B2, OUT2)
    assert jnp.allclose(out2, ref2, atol=1e-4, rtol=1e-4), "fused-path mismatch"

    # --- forced hidden-layer streaming path (v7x large-H design, exercised small) ---
    out3 = jax.block_until_ready(
        clamp_lr_net_forward(x2, params2, num_hl=NHL2, max_limit=0.5,
                             stream_hidden_layers=True))
    assert out3.shape == (B2, OUT2)
    assert jnp.allclose(out3, ref2, atol=1e-4, rtol=1e-4), "streamed-path mismatch"

    # --- bf16 MXU-operand path (v6e/v7x): f32 accumulation, loose sanity check ---
    out4 = jax.block_until_ready(
        clamp_lr_net_forward(x2, params2, num_hl=NHL2, max_limit=0.5,
                             compute_dtype=jnp.bfloat16))
    assert out4.shape == (B2, OUT2)
    assert bool(jnp.all(jnp.isfinite(out4)))
    assert bool(jnp.max(out4) <= 0.5 + 1e-2), "clamp not applied in bf16 path"

    print("KERNEL_OK")
</pallas_src>

<mosaic_0001>
module attributes {stable_mosaic.version = 11 : i64} {
  func.func @_mlp_fused_kernel(%arg0: i32, %arg1: memref<16x4xf32, #tpu.memory_space<vmem>>, %arg2: memref<4x32xf32, #tpu.memory_space<vmem>>, %arg3: memref<1x32xf32, #tpu.memory_space<vmem>>, %arg4: memref<1x32x32xf32, #tpu.memory_space<vmem>>, %arg5: memref<1x1x32xf32, #tpu.memory_space<vmem>>, %arg6: memref<32x1xf32, #tpu.memory_space<vmem>>, %arg7: memref<1x1xf32, #tpu.memory_space<vmem>>, %arg8: memref<16x1xf32, #tpu.memory_space<vmem>>) attributes {dimension_semantics = [#tpu.dimension_semantics<parallel>], iteration_bounds = array<i64: 1>, scalar_prefetch = 0 : i64, scratch_operands = 0 : i64, tpu.core_type = #tpu.core_type<tc>, window_params = [{transform_indices = @transform_0, window_bounds = array<i64: 16, 4>}, {pipeline_mode = #tpu.pipeline_mode<synchronous>, transform_indices = @transform_1, window_bounds = array<i64: 4, 32>}, {pipeline_mode = #tpu.pipeline_mode<synchronous>, transform_indices = @transform_2, window_bounds = array<i64: 1, 32>}, {pipeline_mode = #tpu.pipeline_mode<synchronous>, transform_indices = @transform_3, window_bounds = array<i64: 1, 32, 32>}, {pipeline_mode = #tpu.pipeline_mode<synchronous>, transform_indices = @transform_4, window_bounds = array<i64: 1, 1, 32>}, {pipeline_mode = #tpu.pipeline_mode<synchronous>, transform_indices = @transform_5, window_bounds = array<i64: 32, 1>}, {pipeline_mode = #tpu.pipeline_mode<synchronous>, transform_indices = @transform_6, window_bounds = array<i64: 1, 1>}, {transform_indices = @transform_7, window_bounds = array<i64: 16, 1>}]} {
    %c0 = arith.constant 0 : index
    %c0_0 = arith.constant 0 : index
    %0 = vector.load %arg1[%c0, %c0_0] : memref<16x4xf32, #tpu.memory_space<vmem>>, vector<16x4xf32>
    %c0_1 = arith.constant 0 : index
    %c0_2 = arith.constant 0 : index
    %1 = vector.load %arg2[%c0_1, %c0_2] : memref<4x32xf32, #tpu.memory_space<vmem>>, vector<4x32xf32>
    %cst = arith.constant dense<0.000000e+00> : vector<16x32xf32>
    %2 = tpu.matmul %0, %1, %cst {dimension_numbers = #tpu.dot_dimension_numbers<[1], [0], [0], [1], [0, 0, 1, 1], [], []>} : vector<16x4xf32>, vector<4x32xf32>, vector<16x32xf32> -> vector<16x32xf32>
    %c0_3 = arith.constant 0 : index
    %c0_4 = arith.constant 0 : index
    %3 = vector.load %arg3[%c0_3, %c0_4] : memref<1x32xf32, #tpu.memory_space<vmem>>, vector<1x32xf32>
    %4 = vector.broadcast %3 : vector<1x32xf32> to vector<16x32xf32>
    %5 = arith.addf %2, %4 : vector<16x32xf32>
    %cst_5 = arith.constant 0.000000e+00 : f32
    %6 = vector.broadcast %cst_5 : f32 to vector<16x32xf32>
    %7 = arith.maximumf %5, %6 : vector<16x32xf32>
    %c0_6 = arith.constant 0 : index
    %c0_7 = arith.constant 0 : index
    %c0_8 = arith.constant 0 : index
    %8 = vector.load %arg4[%c0_6, %c0_7, %c0_8] : memref<1x32x32xf32, #tpu.memory_space<vmem>>, vector<1x32x32xf32>
    %9 = vector.shape_cast %8 : vector<1x32x32xf32> to vector<32x32xf32>
    %cst_9 = arith.constant dense<0.000000e+00> : vector<16x32xf32>
    %10 = tpu.matmul %7, %9, %cst_9 {dimension_numbers = #tpu.dot_dimension_numbers<[1], [0], [0], [1], [0, 0, 1, 1], [], []>} : vector<16x32xf32>, vector<32x32xf32>, vector<16x32xf32> -> vector<16x32xf32>
    %c0_10 = arith.constant 0 : index
    %c0_11 = arith.constant 0 : index
    %c0_12 = arith.constant 0 : index
    %11 = vector.load %arg5[%c0_10, %c0_11, %c0_12] : memref<1x1x32xf32, #tpu.memory_space<vmem>>, vector<1x1x32xf32>
    %12 = vector.shape_cast %11 : vector<1x1x32xf32> to vector<1x32xf32>
    %13 = vector.broadcast %12 : vector<1x32xf32> to vector<16x32xf32>
    %14 = arith.addf %10, %13 : vector<16x32xf32>
    %cst_13 = arith.constant 0.000000e+00 : f32
    %15 = vector.broadcast %cst_13 : f32 to vector<16x32xf32>
    %16 = arith.maximumf %14, %15 : vector<16x32xf32>
    %c0_14 = arith.constant 0 : index
    %c0_15 = arith.constant 0 : index
    %17 = vector.load %arg6[%c0_14, %c0_15] : memref<32x1xf32, #tpu.memory_space<vmem>>, vector<32x1xf32>
    %cst_16 = arith.constant dense<0.000000e+00> : vector<16x1xf32>
    %18 = tpu.matmul %16, %17, %cst_16 {dimension_numbers = #tpu.dot_dimension_numbers<[1], [0], [0], [1], [0, 0, 1, 1], [], []>} : vector<16x32xf32>, vector<32x1xf32>, vector<16x1xf32> -> vector<16x1xf32>
    %c0_17 = arith.constant 0 : index
    %c0_18 = arith.constant 0 : index
    %19 = vector.load %arg7[%c0_17, %c0_18] : memref<1x1xf32, #tpu.memory_space<vmem>>, vector<1x1xf32>
    %20 = vector.broadcast %19 : vector<1x1xf32> to vector<16x1xf32>
    %21 = arith.addf %18, %20 : vector<16x1xf32>
    %cst_19 = arith.constant 1.000000e+00 : f32
    %22 = vector.broadcast %cst_19 : f32 to vector<16x1xf32>
    %23 = arith.minimumf %21, %22 : vector<16x1xf32>
    %c0_20 = arith.constant 0 : index
    %c0_21 = arith.constant 0 : index
    %24 = vector.load %arg8[%c0_20, %c0_21] : memref<16x1xf32, #tpu.memory_space<vmem>>, vector<16x1xf32>
    tpu.vector_store %arg8[%c0_20, %c0_21], %23 {strides = array<i32>} : memref<16x1xf32, #tpu.memory_space<vmem>>, vector<16x1xf32>,
    return
  }
  func.func @transform_0(%arg0: i32) -> (i32, i32) {
    %c0_i32 = arith.constant 0 : i32
    %c0_i32_0 = arith.constant 0 : i32
    return %arg0, %c0_i32 : i32, i32
  }
  func.func @transform_1(%arg0: i32) -> (i32, i32) {
    %c0_i32 = arith.constant 0 : i32
    %c0_i32_0 = arith.constant 0 : i32
    %c0_i32_1 = arith.constant 0 : i32
    return %c0_i32, %c0_i32_0 : i32, i32
  }
  func.func @transform_2(%arg0: i32) -> (i32, i32) {
    %c0_i32 = arith.constant 0 : i32
    %c0_i32_0 = arith.constant 0 : i32
    %c0_i32_1 = arith.constant 0 : i32
    return %c0_i32, %c0_i32_0 : i32, i32
  }
  func.func @transform_3(%arg0: i32) -> (i32, i32, i32) {
    %c0_i32 = arith.constant 0 : i32
    %c0_i32_0 = arith.constant 0 : i32
    %c0_i32_1 = arith.constant 0 : i32
    %c0_i32_2 = arith.constant 0 : i32
    return %c0_i32, %c0_i32_0, %c0_i32_1 : i32, i32, i32
  }
  func.func @transform_4(%arg0: i32) -> (i32, i32, i32) {
    %c0_i32 = arith.constant 0 : i32
    %c0_i32_0 = arith.constant 0 : i32
    %c0_i32_1 = arith.constant 0 : i32
    %c0_i32_2 = arith.constant 0 : i32
    return %c0_i32, %c0_i32_0, %c0_i32_1 : i32, i32, i32
  }
  func.func @transform_5(%arg0: i32) -> (i32, i32) {
    %c0_i32 = arith.constant 0 : i32
    %c0_i32_0 = arith.constant 0 : i32
    %c0_i32_1 = arith.constant 0 : i32
    return %c0_i32, %c0_i32_0 : i32, i32
  }
  func.func @transform_6(%arg0: i32) -> (i32, i32) {
    %c0_i32 = arith.constant 0 : i32
    %c0_i32_0 = arith.constant 0 : i32
    %c0_i32_1 = arith.constant 0 : i32
    return %c0_i32, %c0_i32_0 : i32, i32
  }
  func.func @transform_7(%arg0: i32) -> (i32, i32) {
    %c0_i32 = arith.constant 0 : i32
    %c0_i32_0 = arith.constant 0 : i32
    return %arg0, %c0_i32 : i32, i32
  }
}

</mosaic_0001>

<bundles_post_ra>
// kernel: tpu_custom_call.1
= control target key start
LH: loop header
LB: loop body
LE: loop exit
PB: predicated region body
PF: predicated region fallthrough
CT: control target
= control target key end

     0   :  { %vm45_vm0 = vcmask 1043456   ;;  %vm38_vm1 = vcmask 31744   ;;  %vm137_vm2 = vcmask 261120   ;;  %vm315_vm3 = vcmask 7168   ;;  %s482_s1 = inlined_call_operand.vmem [shape: f32[4,32], index: 1, kind: input, shape index: {}]   ;;  %s483_s0 = inlined_call_operand.vmem [shape: f32[16,4], index: 0, kind: input, shape index: {}]   ;;  %s484_s3 = inlined_call_operand.vmem [shape: f32[1,32,32], index: 3, kind: input, shape index: {}]   ;;  %s485_s5 = inlined_call_operand.vmem [shape: f32[32,1], index: 5, kind: input, shape index: {}]   ;;  %s486_s2 = inlined_call_operand.vmem [shape: f32[1,32], index: 2, kind: input, shape index: {}]   ;;  %s487_s6 = inlined_call_operand.<no memory space> [shape: f32[1,1], index: 6, kind: input, shape index: {}]   ;;  %s488_s4 = inlined_call_operand.vmem [shape: f32[1,1,32], index: 4, kind: input, shape index: {}]   ;;  %s489_s7 = inlined_call_operand.vmem [shape: f32[16,1], index: 7, kind: output, shape index: {}]  }
   0x1   :  { %v30_v0 = vld [vmem:[%s482_s1] sm:$0xf]  ;;  %v29_v2 = vld [vmem:[%s483_s0 + $0x8] sm:$0xff]  ;;  %v128_v6 = vld [vmem:[%s484_s3 + $0x10] sm:$0xff]  ;;  %v12_v22 = vstv %s487_s6 }
   0x2   :  { %v28_v1 = vld [vmem:[%s483_s0] sm:$0xff]  ;;  %347 = vmatprep.subr.msk.mxu0 %vm45_vm0, %v30_v0  ;;  %v127_v4 = vld [vmem:[%s484_s3 + $0x8] sm:$0xff]  ;;  %v129_v7 = vld [vmem:[%s484_s3 + $0x18] sm:$0xff]  ;;  %13 = vst [vmem:[#allocation2] sm:$0x1] %v12_v22 }
   0x3   :  { %349 = vmatprep.mubr.msk.f32.mxu0 %vm38_vm1, %v28_v1  ;;  %v126_v3 = vld [vmem:[%s484_s3] sm:$0xff]  ;;  %348 = vmatpush3.msk.msra.mxu0 %vm45_vm0, %v30_v0  ;;  %v378_v8 = vpack.c.bf16 %v129_v7, %v128_v6  ;;  %v222_v10 = vld [vmem:[%s485_s5 + $0x8] sm:$0xff]  ;;  %v223_v19 = vld [vmem:[%s485_s5 + $0x10] sm:$0xff] }
   0x4   :  { %v374_v5 = vpack.c.bf16 %v127_v4, %v126_v3  ;;  %350 = vmatmul.mubr.msk.f32.vlgmr.msra.gmra.mrb[0].mxu0 %vm38_vm1, %v29_v2  ;;  %v221_v9 = vld [vmem:[%s485_s5] sm:$0xff]  ;;  %v224_v20 = vld [vmem:[%s485_s5 + $0x18] sm:$0xff] }
   0x5   :  { %v382_v11 = vpack.c.bf16 %v222_v10, %v221_v9  ;;  %v322_v12 = vld [vmem:[%s486_s2] ss:$0 sm:$0xff]  ;;  %v386_v21 = vpack.c.bf16 %v224_v20, %v223_v19 }
   0x6   :  { %375 = vmatprep.subr.bf16.mxu1 %v374_v5  ;;  %v326_v23 = vld [vmem:[%s488_s4] ss:$0 sm:$0xff] }
   0x7   :  { %377 = vmatpush3.bf16.msra.mxu1 %v374_v5  ;;  %383 = vmatprep.subr.bf16.mxu0 %v382_v11 }
   0x8   :  { %379 = vmatprep.subr.bf16.mxu1 %v378_v8  ;;  %385 = vmatpush3.bf16.msra.mxu0 %v382_v11 }
   0x9   :  { %387 = vmatprep.subr.bf16.mxu0 %v386_v21  ;;  %v329_v30 = vld [vmem:[#allocation2] ss:$0 sm:$0xff] }
   0xb   :  { %381 = vmatpush3.bf16.msra.mxu1 %v378_v8 }
   0xc   :  { %389 = vmatpush3.bf16.msra.mxu0 %v386_v21 }
  0xd7   :  { %v351_v13 = vpop.f32.mrb[0].mxu0 }
  0xd8   :  { %v121_v14 = vadd.f32 %v351_v13, %v322_v12  ;;  %v115_v15 = vpop.f32.mrb[1].mxu0 }
  0xd9   :  { %v116_v16 = vadd.f32 %v322_v12, %v115_v15 }
  0xda   :  { %v125_v18 = vmax.f32 %v121_v14, 0.0 }
  0xdb   :  { %v124_v17 = vmax.f32 %v116_v16, 0.0 }
  0xdd   :  { %360 = vmatprep.mubr.msk.f32.mxu1 %vm137_vm2, %v124_v17 }
  0xde   :  { %361 = vmatmul.mubr.msk.f32.vlgmr.msra.gmra.mrb[0].mxu1 %vm137_vm2, %v125_v18 }
 0x1b1   :  { %v362_v24 = vpop.f32.mrb[0].mxu1 }
 0x1b2   :  { %v216_v25 = vadd.f32 %v362_v24, %v326_v23  ;;  %v210_v26 = vpop.f32.mrb[1].mxu1 }
 0x1b3   :  { %v211_v27 = vadd.f32 %v326_v23, %v210_v26 }
 0x1b4   :  { %v220_v29 = vmax.f32 %v216_v25, 0.0 }
 0x1b5   :  { %v219_v28 = vmax.f32 %v211_v27, 0.0 }
 0x1b7   :  { %371 = vmatprep.mubr.msk.f32.mxu0 %vm137_vm2, %v219_v28 }
 0x1b8   :  { %372 = vmatmul.mubr.msk.f32.vlgmr.msra.gmra.mrb[2].mxu0 %vm137_vm2, %v220_v29 }
 0x28b   :  { %v373_v31 = vpop.f32.mrb[2].mxu0 }
 0x28c   :  { %v310_v32 = vadd.f32 %v373_v31, %v329_v30  ;;  %v304_v33 = vpop.f32.mrb[3].mxu0 }
 0x28d   :  { %v305_v34 = vadd.f32 %v329_v30, %v304_v33 }
 0x28e   :  { %v314_v35 = vmin.f32 %v310_v32, 1.0 }
 0x28f   :  { %v313_v36 = vmin.f32 %v305_v34, 1.0 }
 0x290   :  { %317 = vst.msk [vmem:[%s489_s7 + $0x8] sm:$0xff] %vm315_vm3, %v314_v35 }
 0x291   :  { %316 = vst.msk [vmem:[%s489_s7] sm:$0xff] %vm315_vm3, %v313_v36 }

</bundles_post_ra>
